<compile_context>
chip_gen: v7x
topology: tpu7x:2x2x1
jax: 0.10.0
libtpu: 0.0.40
codegen_flags: <defaults>
</compile_context>

<pallas_src>
import functools
import math

import jax
import jax.numpy as jnp
from jax import lax
from jax.experimental import pallas as pl
from jax.experimental.pallas import tpu as pltpu

_LN_EPS = 1e-5


def _refine_recip(d):
    """EUP approximate reciprocal + one Newton step -> ~f32 accurate, no true divide."""
    r = pl.reciprocal(d, approx=True)
    return r * (2.0 - d * r)


def _layernorm(x, gamma, beta):
    mu = jnp.mean(x, axis=-1, keepdims=True)
    xc = x - mu
    var = jnp.mean(xc * xc, axis=-1, keepdims=True)
    return xc * lax.rsqrt(var + _LN_EPS) * gamma + beta


def _erf(x):
    # Abramowitz & Stegun 7.1.26, |error| < 1.5e-7 (keeps exact-GELU semantics).
    # exp + reciprocal run in the EUP slot; the rest is fmas (VALU).
    a1, a2, a3, a4, a5 = 0.254829592, -0.284496736, 1.421413741, -1.453152027, 1.061405429
    p = 0.3275911
    ax = jnp.abs(x)
    t = _refine_recip(1.0 + p * ax)
    poly = ((((a5 * t + a4) * t + a3) * t + a2) * t + a1) * t
    y = 1.0 - poly * jnp.exp(-ax * ax)
    return jnp.where(x < 0.0, -y, y)


def _gelu_exact(x):
    return 0.5 * x * (1.0 + _erf(x * (1.0 / math.sqrt(2.0))))


def _make_block_kernel(num_heads, head_dim, dim):
    H, Dh, C = num_heads, head_dim, dim

    def kernel(x_ref, wqkv_ref, wp_ref, bp_ref,
               g1_ref, b1_ref, g2_ref, b2_ref,
               w1_ref, bf1_ref, w2_ref, bf2_ref,
               o_ref, attn_sc):
        x = x_ref[...].astype(jnp.float32)                              # (N, C)

        # ---- LN1 (f32 stats) + single lane-dense QKV matmul (bf16 in, f32 acc) ----
        y = _layernorm(x, g1_ref[...], b1_ref[...])
        qkv = jnp.dot(y.astype(jnp.bfloat16), wqkv_ref[...],
                      preferred_element_type=jnp.float32)               # (N, 3C)

        # ---- per-head softmax(q k^T) v ; attention scale pre-folded into Wq ----
        # Static unroll over heads => static lane slices / stores (no dynamic lane math).
        # TODO(synk): for N >~ 150 tokens, tile the kv axis (flash-style online softmax)
        # so the (N, N) scores stay inside the vreg file.
        for h in range(H):
            q_h = qkv[:, h * Dh:(h + 1) * Dh]
            k_h = qkv[:, C + h * Dh:C + (h + 1) * Dh]
            v_h = qkv[:, 2 * C + h * Dh:2 * C + (h + 1) * Dh]
            s = lax.dot_general(q_h.astype(jnp.bfloat16), k_h.astype(jnp.bfloat16),
                                (((1,), (1,)), ((), ())),
                                preferred_element_type=jnp.float32)     # (N, N)
            s = s - jnp.max(s, axis=-1, keepdims=True)
            p = jnp.exp(s)
            p = p * _refine_recip(jnp.sum(p, axis=-1, keepdims=True))
            o_h = jnp.dot(p.astype(jnp.bfloat16), v_h.astype(jnp.bfloat16),
                          preferred_element_type=jnp.float32)           # (N, Dh)
            attn_sc[:, h * Dh:(h + 1) * Dh] = o_h                       # static column slice

        # ---- one lane-dense (N,C)@(C,C) output projection + residual ----
        attn = attn_sc[...]
        proj = jnp.dot(attn.astype(jnp.bfloat16), wp_ref[...],
                       preferred_element_type=jnp.float32) + bp_ref[...]
        x1 = x + proj

        # ---- LN2 + MLP (exact GELU) + residual ----
        y2 = _layernorm(x1, g2_ref[...], b2_ref[...])
        h1 = jnp.dot(y2.astype(jnp.bfloat16), w1_ref[...],
                     preferred_element_type=jnp.float32) + bf1_ref[...]
        h1 = _gelu_exact(h1)
        mlp = jnp.dot(h1.astype(jnp.bfloat16), w2_ref[...],
                      preferred_element_type=jnp.float32) + bf2_ref[...]
        o_ref[...] = (x1 + mlp).astype(o_ref.dtype)

    return kernel


def prepare_params(params, *, num_heads):
    """One-time host-side re-layout (hoisted out of the forward; cache the result):
    PyTorch Linear (out,in) -> (in,out); Wq/Wk/Wv packed into one (C,3C) block with the
    attention scale folded into Wq; all matmul weights cast to bf16 (f32 accumulation in
    the kernel); biases / LN params kept f32."""
    C = params["wq"].shape[0]
    hidden = params["w_fc1"].shape[0]
    Dh = C // num_heads
    scale = Dh ** (-0.5)
    wqkv = jnp.concatenate(
        [(params["wq"] * scale).T, params["wk"].T, params["wv"].T], axis=1
    ).astype(jnp.bfloat16)                                              # (C, 3C)
    return {
        "wqkv": wqkv,
        "wp": params["wp"].T.astype(jnp.bfloat16),                      # (C, C)
        "w1": params["w_fc1"].T.astype(jnp.bfloat16),                   # (C, hidden)
        "w2": params["w_fc2"].T.astype(jnp.bfloat16),                   # (hidden, C)
        "bp": params["bp"].reshape(1, C).astype(jnp.float32),
        "g1": params["g1"].reshape(1, C).astype(jnp.float32),
        "b1": params["b1"].reshape(1, C).astype(jnp.float32),
        "g2": params["g2"].reshape(1, C).astype(jnp.float32),
        "b2": params["b2"].reshape(1, C).astype(jnp.float32),
        "bf1": params["b_fc1"].reshape(1, hidden).astype(jnp.float32),
        "bf2": params["b_fc2"].reshape(1, C).astype(jnp.float32),
    }


@functools.partial(jax.jit, static_argnames=("num_heads",))
def block_forward(x, packed, *, num_heads):
    """x: (B, N, C); packed: output of prepare_params."""
    B, N, C = x.shape
    Dh = C // num_heads
    hidden = packed["w1"].shape[1]
    kernel = _make_block_kernel(num_heads, Dh, C)
    const2 = lambda b: (0, 0)

    return pl.pallas_call(
        kernel,
        out_shape=jax.ShapeDtypeStruct((B, N, C), x.dtype),
        grid_spec=pltpu.PrefetchScalarGridSpec(
            num_scalar_prefetch=0,
            grid=(B,),                                               # batch rows: parallel
            in_specs=[
                pl.BlockSpec((pl.Squeezed(), N, C), lambda b: (b, 0, 0)),  # x (one row)
                pl.BlockSpec((C, 3 * C), const2),                    # packed Wqkv (bf16)
                pl.BlockSpec((C, C), const2),                        # Wproj (bf16)
                pl.BlockSpec((1, C), const2),                        # proj bias
                pl.BlockSpec((1, C), const2),                        # LN1 gamma
                pl.BlockSpec((1, C), const2),                        # LN1 beta
                pl.BlockSpec((1, C), const2),                        # LN2 gamma
                pl.BlockSpec((1, C), const2),                        # LN2 beta
                pl.BlockSpec((C, hidden), const2),                   # fc1 W (bf16)
                pl.BlockSpec((1, hidden), const2),                   # fc1 b
                pl.BlockSpec((hidden, C), const2),                   # fc2 W (bf16)
                pl.BlockSpec((1, C), const2),                        # fc2 b
            ],
            out_specs=pl.BlockSpec((pl.Squeezed(), N, C), lambda b: (b, 0, 0)),
            scratch_shapes=[
                pltpu.VMEM((N, C), jnp.float32),   # concatenated per-head attention output
            ],
        ),
        compiler_params=pltpu.CompilerParams(
            dimension_semantics=("parallel",),
            vmem_limit_bytes=48 * 1024 * 1024,     # above 16/32 MiB defaults, < v7x 64 MiB
        ),
    )(x, packed["wqkv"], packed["wp"], packed["bp"],
      packed["g1"], packed["b1"], packed["g2"], packed["b2"],
      packed["w1"], packed["bf1"], packed["w2"], packed["bf2"])


def block_reference(x, params, *, num_heads):
    """Plain-JAX f32 reference mirroring the PyTorch forward (for verification)."""
    B, N, C = x.shape
    H = num_heads
    Dh = C // H

    def ln(t, g, b):
        mu = t.mean(-1, keepdims=True)
        var = ((t - mu) ** 2).mean(-1, keepdims=True)
        return (t - mu) / jnp.sqrt(var + _LN_EPS) * g + b

    y = ln(x, params["g1"], params["b1"])
    q = y @ params["wq"].T
    k = y @ params["wk"].T
    v = y @ params["wv"].T

    def split(t):
        return t.reshape(B, N, H, Dh).transpose(0, 2, 1, 3)              # (B, H, N, Dh)

    q, k, v = split(q), split(k), split(v)
    s = jnp.einsum("bhqd,bhkd->bhqk", q, k) * Dh ** (-0.5)
    p = jax.nn.softmax(s, axis=-1)
    o = jnp.einsum("bhqk,bhkd->bhqd", p, v).transpose(0, 2, 1, 3).reshape(B, N, C)
    x1 = x + o @ params["wp"].T + params["bp"]

    y2 = ln(x1, params["g2"], params["b2"])
    hmid = jax.nn.gelu(y2 @ params["w_fc1"].T + params["b_fc1"], approximate=False)
    mlp = hmid @ params["w_fc2"].T + params["b_fc2"]
    return x1 + mlp


if __name__ == "__main__":
    # Small, module-consistent shapes: B=2, N=8 tokens, C=32 channels, 4 heads, mlp_ratio=4.
    B, N, C = 2, 8, 32
    num_heads = 4
    hidden = 4 * C

    key = jax.random.PRNGKey(0)
    ks = jax.random.split(key, 16)

    x = jax.random.normal(ks[0], (B, N, C), dtype=jnp.float32)

    def linear_w(k, out_d, in_d):
        bound = 1.0 / math.sqrt(in_d)
        return jax.random.uniform(k, (out_d, in_d), jnp.float32, -bound, bound)

    def linear_b(k, out_d, in_d):
        bound = 1.0 / math.sqrt(in_d)
        return jax.random.uniform(k, (out_d,), jnp.float32, -bound, bound)

    params = {
        "g1": 1.0 + 0.1 * jax.random.normal(ks[1], (C,), jnp.float32),
        "b1": 0.1 * jax.random.normal(ks[2], (C,), jnp.float32),
        "g2": 1.0 + 0.1 * jax.random.normal(ks[3], (C,), jnp.float32),
        "b2": 0.1 * jax.random.normal(ks[4], (C,), jnp.float32),
        "wq": linear_w(ks[5], C, C),
        "wk": linear_w(ks[6], C, C),
        "wv": linear_w(ks[7], C, C),
        "wp": linear_w(ks[8], C, C),
        "bp": linear_b(ks[9], C, C),
        "w_fc1": linear_w(ks[10], hidden, C),
        "b_fc1": linear_b(ks[11], hidden, C),
        "w_fc2": linear_w(ks[12], C, hidden),
        "b_fc2": linear_b(ks[13], C, hidden),
    }

    packed = prepare_params(params, num_heads=num_heads)   # one-time weight re-layout
    out = block_forward(x, packed, num_heads=num_heads)
    out = jax.block_until_ready(out)

    ref = block_reference(x, params, num_heads=num_heads)
    assert out.shape == (B, N, C)
    # Tolerance covers bf16 MXU operands through 5 chained matmuls (f32 accumulation),
    # the EUP approximate-reciprocal (Newton-refined) and the erf polynomial.
    max_err = jnp.max(jnp.abs(out - ref))
    assert jnp.allclose(out, ref, atol=3e-2, rtol=3e-2), (
        f"Pallas output mismatch vs reference, max abs err = {max_err}")

    print("KERNEL_OK")
</pallas_src>

<mosaic_0001>
module attributes {stable_mosaic.version = 11 : i64} {
  func.func @kernel(%arg0: i32, %arg1: memref<1x8x32xf32, #tpu.memory_space<vmem>>, %arg2: memref<32x96xbf16, #tpu.memory_space<vmem>>, %arg3: memref<32x32xbf16, #tpu.memory_space<vmem>>, %arg4: memref<1x32xf32, #tpu.memory_space<vmem>>, %arg5: memref<1x32xf32, #tpu.memory_space<vmem>>, %arg6: memref<1x32xf32, #tpu.memory_space<vmem>>, %arg7: memref<1x32xf32, #tpu.memory_space<vmem>>, %arg8: memref<1x32xf32, #tpu.memory_space<vmem>>, %arg9: memref<32x128xbf16, #tpu.memory_space<vmem>>, %arg10: memref<1x128xf32, #tpu.memory_space<vmem>>, %arg11: memref<128x32xbf16, #tpu.memory_space<vmem>>, %arg12: memref<1x32xf32, #tpu.memory_space<vmem>>, %arg13: memref<1x8x32xf32, #tpu.memory_space<vmem>>, %arg14: memref<8x32xf32, #tpu.memory_space<vmem>>) attributes {dimension_semantics = [#tpu.dimension_semantics<parallel>], iteration_bounds = array<i64: 2>, scalar_prefetch = 0 : i64, scratch_operands = 1 : i64, tpu.core_type = #tpu.core_type<tc>, window_params = [{transform_indices = @transform_0, window_bounds = array<i64: 1, 8, 32>}, {pipeline_mode = #tpu.pipeline_mode<synchronous>, transform_indices = @transform_1, window_bounds = array<i64: 32, 96>}, {pipeline_mode = #tpu.pipeline_mode<synchronous>, transform_indices = @transform_2, window_bounds = array<i64: 32, 32>}, {pipeline_mode = #tpu.pipeline_mode<synchronous>, transform_indices = @transform_3, window_bounds = array<i64: 1, 32>}, {pipeline_mode = #tpu.pipeline_mode<synchronous>, transform_indices = @transform_4, window_bounds = array<i64: 1, 32>}, {pipeline_mode = #tpu.pipeline_mode<synchronous>, transform_indices = @transform_5, window_bounds = array<i64: 1, 32>}, {pipeline_mode = #tpu.pipeline_mode<synchronous>, transform_indices = @transform_6, window_bounds = array<i64: 1, 32>}, {pipeline_mode = #tpu.pipeline_mode<synchronous>, transform_indices = @transform_7, window_bounds = array<i64: 1, 32>}, {pipeline_mode = #tpu.pipeline_mode<synchronous>, transform_indices = @transform_8, window_bounds = array<i64: 32, 128>}, {pipeline_mode = #tpu.pipeline_mode<synchronous>, transform_indices = @transform_9, window_bounds = array<i64: 1, 128>}, {pipeline_mode = #tpu.pipeline_mode<synchronous>, transform_indices = @transform_10, window_bounds = array<i64: 128, 32>}, {pipeline_mode = #tpu.pipeline_mode<synchronous>, transform_indices = @transform_11, window_bounds = array<i64: 1, 32>}, {transform_indices = @transform_12, window_bounds = array<i64: 1, 8, 32>}]} {
    %c0 = arith.constant 0 : index
    %c0_0 = arith.constant 0 : index
    %c0_1 = arith.constant 0 : index
    %0 = vector.load %arg1[%c0, %c0_0, %c0_1] : memref<1x8x32xf32, #tpu.memory_space<vmem>>, vector<1x8x32xf32>
    %1 = vector.shape_cast %0 : vector<1x8x32xf32> to vector<8x32xf32>
    %c0_2 = arith.constant 0 : index
    %c0_3 = arith.constant 0 : index
    %2 = vector.load %arg5[%c0_2, %c0_3] : memref<1x32xf32, #tpu.memory_space<vmem>>, vector<1x32xf32>
    %c0_4 = arith.constant 0 : index
    %c0_5 = arith.constant 0 : index
    %3 = vector.load %arg6[%c0_4, %c0_5] : memref<1x32xf32, #tpu.memory_space<vmem>>, vector<1x32xf32>
    %cst = arith.constant dense<0.000000e+00> : vector<8xf32>
    %4 = vector.multi_reduction <add>, %1, %cst [1] : vector<8x32xf32> to vector<8xf32>
    %5 = vector.shape_cast %4 : vector<8xf32> to vector<8x1xf32>
    %cst_6 = arith.constant 3.200000e+01 : f32
    %6 = vector.broadcast %cst_6 : f32 to vector<8x1xf32>
    %7 = arith.divf %5, %6 : vector<8x1xf32>
    %8 = vector.broadcast %7 : vector<8x1xf32> to vector<8x32xf32>
    %9 = arith.subf %1, %8 : vector<8x32xf32>
    %10 = arith.mulf %9, %9 : vector<8x32xf32>
    %cst_7 = arith.constant dense<0.000000e+00> : vector<8xf32>
    %11 = vector.multi_reduction <add>, %10, %cst_7 [1] : vector<8x32xf32> to vector<8xf32>
    %12 = vector.shape_cast %11 : vector<8xf32> to vector<8x1xf32>
    %cst_8 = arith.constant 3.200000e+01 : f32
    %13 = vector.broadcast %cst_8 : f32 to vector<8x1xf32>
    %14 = arith.divf %12, %13 : vector<8x1xf32>
    %cst_9 = arith.constant 9.99999974E-6 : f32
    %15 = vector.broadcast %cst_9 : f32 to vector<8x1xf32>
    %16 = arith.addf %14, %15 : vector<8x1xf32>
    %17 = math.rsqrt %16 : vector<8x1xf32>
    %18 = vector.broadcast %17 : vector<8x1xf32> to vector<8x32xf32>
    %19 = arith.mulf %9, %18 : vector<8x32xf32>
    %20 = vector.broadcast %2 : vector<1x32xf32> to vector<8x32xf32>
    %21 = arith.mulf %19, %20 : vector<8x32xf32>
    %22 = vector.broadcast %3 : vector<1x32xf32> to vector<8x32xf32>
    %23 = arith.addf %21, %22 : vector<8x32xf32>
    %24 = arith.truncf %23 : vector<8x32xf32> to vector<8x32xbf16>
    %c0_10 = arith.constant 0 : index
    %c0_11 = arith.constant 0 : index
    %25 = vector.load %arg2[%c0_10, %c0_11] : memref<32x96xbf16, #tpu.memory_space<vmem>>, vector<32x96xbf16>
    %cst_12 = arith.constant dense<0.000000e+00> : vector<8x96xf32>
    %26 = tpu.matmul %24, %25, %cst_12 {dimension_numbers = #tpu.dot_dimension_numbers<[1], [0], [0], [1], [0, 0, 1, 1], [], []>} : vector<8x32xbf16>, vector<32x96xbf16>, vector<8x96xf32> -> vector<8x96xf32>
    %27 = vector.extract_strided_slice %26 {offsets = [0, 0], sizes = [8, 8], strides = [1, 1]} : vector<8x96xf32> to vector<8x8xf32>
    %28 = vector.extract_strided_slice %26 {offsets = [0, 32], sizes = [8, 8], strides = [1, 1]} : vector<8x96xf32> to vector<8x8xf32>
    %29 = vector.extract_strided_slice %26 {offsets = [0, 64], sizes = [8, 8], strides = [1, 1]} : vector<8x96xf32> to vector<8x8xf32>
    %30 = arith.truncf %27 : vector<8x8xf32> to vector<8x8xbf16>
    %31 = arith.truncf %28 : vector<8x8xf32> to vector<8x8xbf16>
    %cst_13 = arith.constant dense<0.000000e+00> : vector<8x8xf32>
    %32 = tpu.matmul %30, %31, %cst_13 {dimension_numbers = #tpu.dot_dimension_numbers<[1], [1], [0], [0], [0, 0, 1, 0], [], []>} : vector<8x8xbf16>, vector<8x8xbf16>, vector<8x8xf32> -> vector<8x8xf32>
    %cst_14 = arith.constant dense<0xFF800000> : vector<8xf32>
    %33 = vector.multi_reduction <maximumf>, %32, %cst_14 [1] : vector<8x8xf32> to vector<8xf32>
    %34 = vector.shape_cast %33 : vector<8xf32> to vector<8x1xf32>
    %35 = vector.broadcast %34 : vector<8x1xf32> to vector<8x8xf32>
    %36 = arith.subf %32, %35 : vector<8x8xf32>
    %37 = math.exp %36 : vector<8x8xf32>
    %cst_15 = arith.constant dense<0.000000e+00> : vector<8xf32>
    %38 = vector.multi_reduction <add>, %37, %cst_15 [1] : vector<8x8xf32> to vector<8xf32>
    %39 = vector.shape_cast %38 : vector<8xf32> to vector<8x1xf32>
    %40 = tpu.reciprocal %39 {approx = true} : vector<8x1xf32> -> vector<8x1xf32>
    %41 = arith.mulf %39, %40 : vector<8x1xf32>
    %cst_16 = arith.constant 2.000000e+00 : f32
    %42 = vector.broadcast %cst_16 : f32 to vector<8x1xf32>
    %43 = arith.subf %42, %41 : vector<8x1xf32>
    %44 = arith.mulf %40, %43 : vector<8x1xf32>
    %45 = vector.broadcast %44 : vector<8x1xf32> to vector<8x8xf32>
    %46 = arith.mulf %37, %45 : vector<8x8xf32>
    %47 = arith.truncf %46 : vector<8x8xf32> to vector<8x8xbf16>
    %48 = arith.truncf %29 : vector<8x8xf32> to vector<8x8xbf16>
    %cst_17 = arith.constant dense<0.000000e+00> : vector<8x8xf32>
    %49 = tpu.matmul %47, %48, %cst_17 {dimension_numbers = #tpu.dot_dimension_numbers<[1], [0], [0], [1], [0, 0, 1, 1], [], []>} : vector<8x8xbf16>, vector<8x8xbf16>, vector<8x8xf32> -> vector<8x8xf32>
    %c0_18 = arith.constant 0 : index
    %c0_19 = arith.constant 0 : index
    %50 = vector.load %arg14[%c0_18, %c0_19] : memref<8x32xf32, #tpu.memory_space<vmem>>, vector<8x8xf32>
    tpu.vector_store %arg14[%c0_18, %c0_19], %49 {strides = array<i32>} : memref<8x32xf32, #tpu.memory_space<vmem>>, vector<8x8xf32>,
    %51 = vector.extract_strided_slice %26 {offsets = [0, 8], sizes = [8, 8], strides = [1, 1]} : vector<8x96xf32> to vector<8x8xf32>
    %52 = vector.extract_strided_slice %26 {offsets = [0, 40], sizes = [8, 8], strides = [1, 1]} : vector<8x96xf32> to vector<8x8xf32>
    %53 = vector.extract_strided_slice %26 {offsets = [0, 72], sizes = [8, 8], strides = [1, 1]} : vector<8x96xf32> to vector<8x8xf32>
    %54 = arith.truncf %51 : vector<8x8xf32> to vector<8x8xbf16>
    %55 = arith.truncf %52 : vector<8x8xf32> to vector<8x8xbf16>
    %cst_20 = arith.constant dense<0.000000e+00> : vector<8x8xf32>
    %56 = tpu.matmul %54, %55, %cst_20 {dimension_numbers = #tpu.dot_dimension_numbers<[1], [1], [0], [0], [0, 0, 1, 0], [], []>} : vector<8x8xbf16>, vector<8x8xbf16>, vector<8x8xf32> -> vector<8x8xf32>
    %cst_21 = arith.constant dense<0xFF800000> : vector<8xf32>
    %57 = vector.multi_reduction <maximumf>, %56, %cst_21 [1] : vector<8x8xf32> to vector<8xf32>
    %58 = vector.shape_cast %57 : vector<8xf32> to vector<8x1xf32>
    %59 = vector.broadcast %58 : vector<8x1xf32> to vector<8x8xf32>
    %60 = arith.subf %56, %59 : vector<8x8xf32>
    %61 = math.exp %60 : vector<8x8xf32>
    %cst_22 = arith.constant dense<0.000000e+00> : vector<8xf32>
    %62 = vector.multi_reduction <add>, %61, %cst_22 [1] : vector<8x8xf32> to vector<8xf32>
    %63 = vector.shape_cast %62 : vector<8xf32> to vector<8x1xf32>
    %64 = tpu.reciprocal %63 {approx = true} : vector<8x1xf32> -> vector<8x1xf32>
    %65 = arith.mulf %63, %64 : vector<8x1xf32>
    %cst_23 = arith.constant 2.000000e+00 : f32
    %66 = vector.broadcast %cst_23 : f32 to vector<8x1xf32>
    %67 = arith.subf %66, %65 : vector<8x1xf32>
    %68 = arith.mulf %64, %67 : vector<8x1xf32>
    %69 = vector.broadcast %68 : vector<8x1xf32> to vector<8x8xf32>
    %70 = arith.mulf %61, %69 : vector<8x8xf32>
    %71 = arith.truncf %70 : vector<8x8xf32> to vector<8x8xbf16>
    %72 = arith.truncf %53 : vector<8x8xf32> to vector<8x8xbf16>
    %cst_24 = arith.constant dense<0.000000e+00> : vector<8x8xf32>
    %73 = tpu.matmul %71, %72, %cst_24 {dimension_numbers = #tpu.dot_dimension_numbers<[1], [0], [0], [1], [0, 0, 1, 1], [], []>} : vector<8x8xbf16>, vector<8x8xbf16>, vector<8x8xf32> -> vector<8x8xf32>
    %c0_25 = arith.constant 0 : index
    %c8 = arith.constant 8 : index
    %74 = vector.load %arg14[%c0_25, %c8] : memref<8x32xf32, #tpu.memory_space<vmem>>, vector<8x8xf32>
    tpu.vector_store %arg14[%c0_25, %c8], %73 {strides = array<i32>} : memref<8x32xf32, #tpu.memory_space<vmem>>, vector<8x8xf32>,
    %75 = vector.extract_strided_slice %26 {offsets = [0, 16], sizes = [8, 8], strides = [1, 1]} : vector<8x96xf32> to vector<8x8xf32>
    %76 = vector.extract_strided_slice %26 {offsets = [0, 48], sizes = [8, 8], strides = [1, 1]} : vector<8x96xf32> to vector<8x8xf32>
    %77 = vector.extract_strided_slice %26 {offsets = [0, 80], sizes = [8, 8], strides = [1, 1]} : vector<8x96xf32> to vector<8x8xf32>
    %78 = arith.truncf %75 : vector<8x8xf32> to vector<8x8xbf16>
    %79 = arith.truncf %76 : vector<8x8xf32> to vector<8x8xbf16>
    %cst_26 = arith.constant dense<0.000000e+00> : vector<8x8xf32>
    %80 = tpu.matmul %78, %79, %cst_26 {dimension_numbers = #tpu.dot_dimension_numbers<[1], [1], [0], [0], [0, 0, 1, 0], [], []>} : vector<8x8xbf16>, vector<8x8xbf16>, vector<8x8xf32> -> vector<8x8xf32>
    %cst_27 = arith.constant dense<0xFF800000> : vector<8xf32>
    %81 = vector.multi_reduction <maximumf>, %80, %cst_27 [1] : vector<8x8xf32> to vector<8xf32>
    %82 = vector.shape_cast %81 : vector<8xf32> to vector<8x1xf32>
    %83 = vector.broadcast %82 : vector<8x1xf32> to vector<8x8xf32>
    %84 = arith.subf %80, %83 : vector<8x8xf32>
    %85 = math.exp %84 : vector<8x8xf32>
    %cst_28 = arith.constant dense<0.000000e+00> : vector<8xf32>
    %86 = vector.multi_reduction <add>, %85, %cst_28 [1] : vector<8x8xf32> to vector<8xf32>
    %87 = vector.shape_cast %86 : vector<8xf32> to vector<8x1xf32>
    %88 = tpu.reciprocal %87 {approx = true} : vector<8x1xf32> -> vector<8x1xf32>
    %89 = arith.mulf %87, %88 : vector<8x1xf32>
    %cst_29 = arith.constant 2.000000e+00 : f32
    %90 = vector.broadcast %cst_29 : f32 to vector<8x1xf32>
    %91 = arith.subf %90, %89 : vector<8x1xf32>
    %92 = arith.mulf %88, %91 : vector<8x1xf32>
    %93 = vector.broadcast %92 : vector<8x1xf32> to vector<8x8xf32>
    %94 = arith.mulf %85, %93 : vector<8x8xf32>
    %95 = arith.truncf %94 : vector<8x8xf32> to vector<8x8xbf16>
    %96 = arith.truncf %77 : vector<8x8xf32> to vector<8x8xbf16>
    %cst_30 = arith.constant dense<0.000000e+00> : vector<8x8xf32>
    %97 = tpu.matmul %95, %96, %cst_30 {dimension_numbers = #tpu.dot_dimension_numbers<[1], [0], [0], [1], [0, 0, 1, 1], [], []>} : vector<8x8xbf16>, vector<8x8xbf16>, vector<8x8xf32> -> vector<8x8xf32>
    %c0_31 = arith.constant 0 : index
    %c16 = arith.constant 16 : index
    %98 = vector.load %arg14[%c0_31, %c16] : memref<8x32xf32, #tpu.memory_space<vmem>>, vector<8x8xf32>
    tpu.vector_store %arg14[%c0_31, %c16], %97 {strides = array<i32>} : memref<8x32xf32, #tpu.memory_space<vmem>>, vector<8x8xf32>,
    %99 = vector.extract_strided_slice %26 {offsets = [0, 24], sizes = [8, 8], strides = [1, 1]} : vector<8x96xf32> to vector<8x8xf32>
    %100 = vector.extract_strided_slice %26 {offsets = [0, 56], sizes = [8, 8], strides = [1, 1]} : vector<8x96xf32> to vector<8x8xf32>
    %101 = vector.extract_strided_slice %26 {offsets = [0, 88], sizes = [8, 8], strides = [1, 1]} : vector<8x96xf32> to vector<8x8xf32>
    %102 = arith.truncf %99 : vector<8x8xf32> to vector<8x8xbf16>
    %103 = arith.truncf %100 : vector<8x8xf32> to vector<8x8xbf16>
    %cst_32 = arith.constant dense<0.000000e+00> : vector<8x8xf32>
    %104 = tpu.matmul %102, %103, %cst_32 {dimension_numbers = #tpu.dot_dimension_numbers<[1], [1], [0], [0], [0, 0, 1, 0], [], []>} : vector<8x8xbf16>, vector<8x8xbf16>, vector<8x8xf32> -> vector<8x8xf32>
    %cst_33 = arith.constant dense<0xFF800000> : vector<8xf32>
    %105 = vector.multi_reduction <maximumf>, %104, %cst_33 [1] : vector<8x8xf32> to vector<8xf32>
    %106 = vector.shape_cast %105 : vector<8xf32> to vector<8x1xf32>
    %107 = vector.broadcast %106 : vector<8x1xf32> to vector<8x8xf32>
    %108 = arith.subf %104, %107 : vector<8x8xf32>
    %109 = math.exp %108 : vector<8x8xf32>
    %cst_34 = arith.constant dense<0.000000e+00> : vector<8xf32>
    %110 = vector.multi_reduction <add>, %109, %cst_34 [1] : vector<8x8xf32> to vector<8xf32>
    %111 = vector.shape_cast %110 : vector<8xf32> to vector<8x1xf32>
    %112 = tpu.reciprocal %111 {approx = true} : vector<8x1xf32> -> vector<8x1xf32>
    %113 = arith.mulf %111, %112 : vector<8x1xf32>
    %cst_35 = arith.constant 2.000000e+00 : f32
    %114 = vector.broadcast %cst_35 : f32 to vector<8x1xf32>
    %115 = arith.subf %114, %113 : vector<8x1xf32>
    %116 = arith.mulf %112, %115 : vector<8x1xf32>
    %117 = vector.broadcast %116 : vector<8x1xf32> to vector<8x8xf32>
    %118 = arith.mulf %109, %117 : vector<8x8xf32>
    %119 = arith.truncf %118 : vector<8x8xf32> to vector<8x8xbf16>
    %120 = arith.truncf %101 : vector<8x8xf32> to vector<8x8xbf16>
    %cst_36 = arith.constant dense<0.000000e+00> : vector<8x8xf32>
    %121 = tpu.matmul %119, %120, %cst_36 {dimension_numbers = #tpu.dot_dimension_numbers<[1], [0], [0], [1], [0, 0, 1, 1], [], []>} : vector<8x8xbf16>, vector<8x8xbf16>, vector<8x8xf32> -> vector<8x8xf32>
    %c0_37 = arith.constant 0 : index
    %c24 = arith.constant 24 : index
    %122 = vector.load %arg14[%c0_37, %c24] : memref<8x32xf32, #tpu.memory_space<vmem>>, vector<8x8xf32>
    tpu.vector_store %arg14[%c0_37, %c24], %121 {strides = array<i32>} : memref<8x32xf32, #tpu.memory_space<vmem>>, vector<8x8xf32>,
    %c0_38 = arith.constant 0 : index
    %c0_39 = arith.constant 0 : index
    %123 = vector.load %arg14[%c0_38, %c0_39] : memref<8x32xf32, #tpu.memory_space<vmem>>, vector<8x32xf32>
    %124 = arith.truncf %123 : vector<8x32xf32> to vector<8x32xbf16>
    %c0_40 = arith.constant 0 : index
    %c0_41 = arith.constant 0 : index
    %125 = vector.load %arg3[%c0_40, %c0_41] : memref<32x32xbf16, #tpu.memory_space<vmem>>, vector<32x32xbf16>
    %cst_42 = arith.constant dense<0.000000e+00> : vector<8x32xf32>
    %126 = tpu.matmul %124, %125, %cst_42 {dimension_numbers = #tpu.dot_dimension_numbers<[1], [0], [0], [1], [0, 0, 1, 1], [], []>} : vector<8x32xbf16>, vector<32x32xbf16>, vector<8x32xf32> -> vector<8x32xf32>
    %c0_43 = arith.constant 0 : index
    %c0_44 = arith.constant 0 : index
    %127 = vector.load %arg4[%c0_43, %c0_44] : memref<1x32xf32, #tpu.memory_space<vmem>>, vector<1x32xf32>
    %128 = vector.broadcast %127 : vector<1x32xf32> to vector<8x32xf32>
    %129 = arith.addf %126, %128 : vector<8x32xf32>
    %130 = arith.addf %1, %129 : vector<8x32xf32>
    %c0_45 = arith.constant 0 : index
    %c0_46 = arith.constant 0 : index
    %131 = vector.load %arg7[%c0_45, %c0_46] : memref<1x32xf32, #tpu.memory_space<vmem>>, vector<1x32xf32>
    %c0_47 = arith.constant 0 : index
    %c0_48 = arith.constant 0 : index
    %132 = vector.load %arg8[%c0_47, %c0_48] : memref<1x32xf32, #tpu.memory_space<vmem>>, vector<1x32xf32>
    %cst_49 = arith.constant dense<0.000000e+00> : vector<8xf32>
    %133 = vector.multi_reduction <add>, %130, %cst_49 [1] : vector<8x32xf32> to vector<8xf32>
    %134 = vector.shape_cast %133 : vector<8xf32> to vector<8x1xf32>
    %cst_50 = arith.constant 3.200000e+01 : f32
    %135 = vector.broadcast %cst_50 : f32 to vector<8x1xf32>
    %136 = arith.divf %134, %135 : vector<8x1xf32>
    %137 = vector.broadcast %136 : vector<8x1xf32> to vector<8x32xf32>
    %138 = arith.subf %130, %137 : vector<8x32xf32>
    %139 = arith.mulf %138, %138 : vector<8x32xf32>
    %cst_51 = arith.constant dense<0.000000e+00> : vector<8xf32>
    %140 = vector.multi_reduction <add>, %139, %cst_51 [1] : vector<8x32xf32> to vector<8xf32>
    %141 = vector.shape_cast %140 : vector<8xf32> to vector<8x1xf32>
    %cst_52 = arith.constant 3.200000e+01 : f32
    %142 = vector.broadcast %cst_52 : f32 to vector<8x1xf32>
    %143 = arith.divf %141, %142 : vector<8x1xf32>
    %cst_53 = arith.constant 9.99999974E-6 : f32
    %144 = vector.broadcast %cst_53 : f32 to vector<8x1xf32>
    %145 = arith.addf %143, %144 : vector<8x1xf32>
    %146 = math.rsqrt %145 : vector<8x1xf32>
    %147 = vector.broadcast %146 : vector<8x1xf32> to vector<8x32xf32>
    %148 = arith.mulf %138, %147 : vector<8x32xf32>
    %149 = vector.broadcast %131 : vector<1x32xf32> to vector<8x32xf32>
    %150 = arith.mulf %148, %149 : vector<8x32xf32>
    %151 = vector.broadcast %132 : vector<1x32xf32> to vector<8x32xf32>
    %152 = arith.addf %150, %151 : vector<8x32xf32>
    %153 = arith.truncf %152 : vector<8x32xf32> to vector<8x32xbf16>
    %c0_54 = arith.constant 0 : index
    %c0_55 = arith.constant 0 : index
    %154 = vector.load %arg9[%c0_54, %c0_55] : memref<32x128xbf16, #tpu.memory_space<vmem>>, vector<32x128xbf16>
    %cst_56 = arith.constant dense<0.000000e+00> : vector<8x128xf32>
    %155 = tpu.matmul %153, %154, %cst_56 {dimension_numbers = #tpu.dot_dimension_numbers<[1], [0], [0], [1], [0, 0, 1, 1], [], []>} : vector<8x32xbf16>, vector<32x128xbf16>, vector<8x128xf32> -> vector<8x128xf32>
    %c0_57 = arith.constant 0 : index
    %c0_58 = arith.constant 0 : index
    %156 = vector.load %arg10[%c0_57, %c0_58] : memref<1x128xf32, #tpu.memory_space<vmem>>, vector<1x128xf32>
    %157 = vector.broadcast %156 : vector<1x128xf32> to vector<8x128xf32>
    %158 = arith.addf %155, %157 : vector<8x128xf32>
    %cst_59 = arith.constant 5.000000e-01 : f32
    %159 = vector.broadcast %cst_59 : f32 to vector<8x128xf32>
    %160 = arith.mulf %159, %158 : vector<8x128xf32>
    %cst_60 = arith.constant 0.707106769 : f32
    %161 = vector.broadcast %cst_60 : f32 to vector<8x128xf32>
    %162 = arith.mulf %158, %161 : vector<8x128xf32>
    %163 = math.absf %162 : vector<8x128xf32>
    %cst_61 = arith.constant 0.327591091 : f32
    %164 = vector.broadcast %cst_61 : f32 to vector<8x128xf32>
    %165 = arith.mulf %164, %163 : vector<8x128xf32>
    %cst_62 = arith.constant 1.000000e+00 : f32
    %166 = vector.broadcast %cst_62 : f32 to vector<8x128xf32>
    %167 = arith.addf %166, %165 : vector<8x128xf32>
    %168 = tpu.reciprocal %167 {approx = true} : vector<8x128xf32> -> vector<8x128xf32>
    %169 = arith.mulf %167, %168 : vector<8x128xf32>
    %cst_63 = arith.constant 2.000000e+00 : f32
    %170 = vector.broadcast %cst_63 : f32 to vector<8x128xf32>
    %171 = arith.subf %170, %169 : vector<8x128xf32>
    %172 = arith.mulf %168, %171 : vector<8x128xf32>
    %cst_64 = arith.constant 1.06140542 : f32
    %173 = vector.broadcast %cst_64 : f32 to vector<8x128xf32>
    %174 = arith.mulf %173, %172 : vector<8x128xf32>
    %cst_65 = arith.constant -1.45315206 : f32
    %175 = vector.broadcast %cst_65 : f32 to vector<8x128xf32>
    %176 = arith.addf %174, %175 : vector<8x128xf32>
    %177 = arith.mulf %176, %172 : vector<8x128xf32>
    %cst_66 = arith.constant 1.42141378 : f32
    %178 = vector.broadcast %cst_66 : f32 to vector<8x128xf32>
    %179 = arith.addf %177, %178 : vector<8x128xf32>
    %180 = arith.mulf %179, %172 : vector<8x128xf32>
    %cst_67 = arith.constant -0.284496725 : f32
    %181 = vector.broadcast %cst_67 : f32 to vector<8x128xf32>
    %182 = arith.addf %180, %181 : vector<8x128xf32>
    %183 = arith.mulf %182, %172 : vector<8x128xf32>
    %cst_68 = arith.constant 0.254829586 : f32
    %184 = vector.broadcast %cst_68 : f32 to vector<8x128xf32>
    %185 = arith.addf %183, %184 : vector<8x128xf32>
    %186 = arith.mulf %185, %172 : vector<8x128xf32>
    %cst_69 = arith.constant 0.000000e+00 : f32
    %187 = vector.broadcast %cst_69 : f32 to vector<8x128xf32>
    %188 = arith.subf %187, %163 : vector<8x128xf32>
    %189 = arith.mulf %188, %163 : vector<8x128xf32>
    %190 = math.exp %189 : vector<8x128xf32>
    %191 = arith.mulf %186, %190 : vector<8x128xf32>
    %cst_70 = arith.constant 1.000000e+00 : f32
    %192 = vector.broadcast %cst_70 : f32 to vector<8x128xf32>
    %193 = arith.subf %192, %191 : vector<8x128xf32>
    %cst_71 = arith.constant 0.000000e+00 : f32
    %194 = vector.broadcast %cst_71 : f32 to vector<8x128xf32>
    %195 = arith.cmpf olt, %162, %194 : vector<8x128xf32>
    %cst_72 = arith.constant 0.000000e+00 : f32
    %196 = vector.broadcast %cst_72 : f32 to vector<8x128xf32>
    %197 = arith.subf %196, %193 : vector<8x128xf32>
    %198 = arith.select %195, %197, %193 : vector<8x128xi1>, vector<8x128xf32>
    %cst_73 = arith.constant 1.000000e+00 : f32
    %199 = vector.broadcast %cst_73 : f32 to vector<8x128xf32>
    %200 = arith.addf %199, %198 : vector<8x128xf32>
    %201 = arith.mulf %160, %200 : vector<8x128xf32>
    %202 = arith.truncf %201 : vector<8x128xf32> to vector<8x128xbf16>
    %c0_74 = arith.constant 0 : index
    %c0_75 = arith.constant 0 : index
    %203 = vector.load %arg11[%c0_74, %c0_75] : memref<128x32xbf16, #tpu.memory_space<vmem>>, vector<128x32xbf16>
    %cst_76 = arith.constant dense<0.000000e+00> : vector<8x32xf32>
    %204 = tpu.matmul %202, %203, %cst_76 {dimension_numbers = #tpu.dot_dimension_numbers<[1], [0], [0], [1], [0, 0, 1, 1], [], []>} : vector<8x128xbf16>, vector<128x32xbf16>, vector<8x32xf32> -> vector<8x32xf32>
    %c0_77 = arith.constant 0 : index
    %c0_78 = arith.constant 0 : index
    %205 = vector.load %arg12[%c0_77, %c0_78] : memref<1x32xf32, #tpu.memory_space<vmem>>, vector<1x32xf32>
    %206 = vector.broadcast %205 : vector<1x32xf32> to vector<8x32xf32>
    %207 = arith.addf %204, %206 : vector<8x32xf32>
    %208 = arith.addf %130, %207 : vector<8x32xf32>
    %c0_79 = arith.constant 0 : index
    %c0_80 = arith.constant 0 : index
    %c0_81 = arith.constant 0 : index
    %209 = vector.load %arg13[%c0_79, %c0_80, %c0_81] : memref<1x8x32xf32, #tpu.memory_space<vmem>>, vector<1x8x32xf32>
    %210 = vector.shape_cast %209 : vector<1x8x32xf32> to vector<8x32xf32>
    %211 = vector.shape_cast %208 : vector<8x32xf32> to vector<1x8x32xf32>
    tpu.vector_store %arg13[%c0_79, %c0_80, %c0_81], %211 {strides = array<i32>} : memref<1x8x32xf32, #tpu.memory_space<vmem>>, vector<1x8x32xf32>,
    return
  }
  func.func @transform_0(%arg0: i32) -> (i32, i32, i32) {
    %c0_i32 = arith.constant 0 : i32
    %c0_i32_0 = arith.constant 0 : i32
    %c0_i32_1 = arith.constant 0 : i32
    return %arg0, %c0_i32, %c0_i32_0 : i32, i32, i32
  }
  func.func @transform_1(%arg0: i32) -> (i32, i32) {
    %c0_i32 = arith.constant 0 : i32
    %c0_i32_0 = arith.constant 0 : i32
    %c0_i32_1 = arith.constant 0 : i32
    return %c0_i32, %c0_i32_0 : i32, i32
  }
  func.func @transform_2(%arg0: i32) -> (i32, i32) {
    %c0_i32 = arith.constant 0 : i32
    %c0_i32_0 = arith.constant 0 : i32
    %c0_i32_1 = arith.constant 0 : i32
    return %c0_i32, %c0_i32_0 : i32, i32
  }
  func.func @transform_3(%arg0: i32) -> (i32, i32) {
    %c0_i32 = arith.constant 0 : i32
    %c0_i32_0 = arith.constant 0 : i32
    %c0_i32_1 = arith.constant 0 : i32
    return %c0_i32, %c0_i32_0 : i32, i32
  }
  func.func @transform_4(%arg0: i32) -> (i32, i32) {
    %c0_i32 = arith.constant 0 : i32
    %c0_i32_0 = arith.constant 0 : i32
    %c0_i32_1 = arith.constant 0 : i32
    return %c0_i32, %c0_i32_0 : i32, i32
  }
  func.func @transform_5(%arg0: i32) -> (i32, i32) {
    %c0_i32 = arith.constant 0 : i32
    %c0_i32_0 = arith.constant 0 : i32
    %c0_i32_1 = arith.constant 0 : i32
    return %c0_i32, %c0_i32_0 : i32, i32
  }
  func.func @transform_6(%arg0: i32) -> (i32, i32) {
    %c0_i32 = arith.constant 0 : i32
    %c0_i32_0 = arith.constant 0 : i32
    %c0_i32_1 = arith.constant 0 : i32
    return %c0_i32, %c0_i32_0 : i32, i32
  }
  func.func @transform_7(%arg0: i32) -> (i32, i32) {
    %c0_i32 = arith.constant 0 : i32
    %c0_i32_0 = arith.constant 0 : i32
    %c0_i32_1 = arith.constant 0 : i32
    return %c0_i32, %c0_i32_0 : i32, i32
  }
  func.func @transform_8(%arg0: i32) -> (i32, i32) {
    %c0_i32 = arith.constant 0 : i32
    %c0_i32_0 = arith.constant 0 : i32
    %c0_i32_1 = arith.constant 0 : i32
    return %c0_i32, %c0_i32_0 : i32, i32
  }
  func.func @transform_9(%arg0: i32) -> (i32, i32) {
    %c0_i32 = arith.constant 0 : i32
    %c0_i32_0 = arith.constant 0 : i32
    %c0_i32_1 = arith.constant 0 : i32
    return %c0_i32, %c0_i32_0 : i32, i32
  }
  func.func @transform_10(%arg0: i32) -> (i32, i32) {
    %c0_i32 = arith.constant 0 : i32
    %c0_i32_0 = arith.constant 0 : i32
    %c0_i32_1 = arith.constant 0 : i32
    return %c0_i32, %c0_i32_0 : i32, i32
  }
  func.func @transform_11(%arg0: i32) -> (i32, i32) {
    %c0_i32 = arith.constant 0 : i32
    %c0_i32_0 = arith.constant 0 : i32
    %c0_i32_1 = arith.constant 0 : i32
    return %c0_i32, %c0_i32_0 : i32, i32
  }
  func.func @transform_12(%arg0: i32) -> (i32, i32, i32) {
    %c0_i32 = arith.constant 0 : i32
    %c0_i32_0 = arith.constant 0 : i32
    %c0_i32_1 = arith.constant 0 : i32
    return %arg0, %c0_i32, %c0_i32_0 : i32, i32, i32
  }
}

</mosaic_0001>

<bundles_post_ra>
// kernel: block_forward.1
= control target key start
LH: loop header
LB: loop body
LE: loop exit
PB: predicated region body
PF: predicated region fallthrough
CT: control target
= control target key end

     0   :  { %s2033_s0 = inlined_call_operand.vmem [shape: f32[2,8,32], index: 0, kind: input, shape index: {}]   ;;  %s2034_s1 = inlined_call_operand.vmem [shape: bf16[32,96], index: 1, kind: input, shape index: {}]   ;;  %s2035_s2 = inlined_call_operand.vmem [shape: bf16[32,32], index: 2, kind: input, shape index: {}]   ;;  %s2036_s3 = inlined_call_operand.vmem [shape: f32[1,32], index: 3, kind: input, shape index: {}]   ;;  %s2037_s4 = inlined_call_operand.vmem [shape: f32[1,32], index: 4, kind: input, shape index: {}]   ;;  %s2038_s5 = inlined_call_operand.vmem [shape: f32[1,32], index: 5, kind: input, shape index: {}]   ;;  %s2039_s6 = inlined_call_operand.vmem [shape: f32[1,32], index: 6, kind: input, shape index: {}]   ;;  %s2040_s7 = inlined_call_operand.vmem [shape: f32[1,32], index: 7, kind: input, shape index: {}]   ;;  %s2041_s8 = inlined_call_operand.vmem [shape: bf16[32,128], index: 8, kind: input, shape index: {}]   ;;  %s2042_s9 = inlined_call_operand.vmem [shape: f32[1,128], index: 9, kind: input, shape index: {}]   ;;  %s2043_s10 = inlined_call_operand.vmem [shape: bf16[128,32], index: 10, kind: input, shape index: {}]   ;;  %s2044_s11 = inlined_call_operand.vmem [shape: f32[1,32], index: 11, kind: input, shape index: {}]   ;;  %s2045_s12 = inlined_call_operand.hbm [shape: f32[2,8,32], index: 12, kind: output, shape index: {}]  }
   0x1   :  { %2046 = sst [smem:[#allocation6_spill]] %s2033_s0 }
   0x2   :  { %2047 = sst [smem:[#allocation7_spill]] %s2034_s1 }
   0x3   :  { %17 = vsyncpa [#allocation4], 0 }
   0x4   :  { %19 = vsyncpa [#allocation4 + $0x1], 0  ;;  %s1763_s21 = smov 0   ;;  %s1765_s22 = smov 0  }
   0x5   :  { %s1767_s23 = smov 0   ;;  %s1769_s24 = smov 0  }
   0x6 LB: > { %s1784_s25 = sadd.s32 4294967295, %s1679_s24   ;;  %s1356_s26 = sadd.s32 4294967294, %s1679_s24   ;;  %s1679_s24 = sphi %s1769_s24, %s2055_s24   ;;  %s1675_s23 = sphi %s1767_s23, %s2054_s23   ;;  %s1671_s22 = sphi %s1765_s22, %s2053_s22   ;;  %s1667_s21 = sphi %s1763_s21, %s2052_s21  }
   0x7   : > { %s1788_s27 = sadd.s32 1, %s1679_s24   ;;  %s289_s28 = sadd.s32 1, %s1675_s23 }
   0x8   : > { %s286_s29 = ssub.s32 %s1679_s24, %s1788_s27  ;;  %p299_p0 = scmp.ne.s32.totalorder %s1675_s23, %s1671_s22 }
   0x9   : > { %p287_p1 = scmp.eq.s32.totalorder %s286_s29, 0  ;;  %p300_p2 = scmp.eq.s32.totalorder %s1784_s25, 1 }
   0xa   : > { %p305_p3 = scmp.ne.s32.totalorder %s1671_s22, %s1667_s21  ;;  %p306_p4 = scmp.eq.s32.totalorder %s1356_s26, 1 }
   0xb   : > { %s1799_s30 = scalar_select %p287_p1, %s1675_s23, %s289_s28  }
   0xc   : > { %p1801_p5 = por %p300_p2, %p299_p0  ;;  %p1805_p6 = por %p306_p4, %p305_p3 }
   0xd   : > { %p1359_p7 = scmp.ge.s32.totalorder %s1679_s24, 1  ;;  %p364_p8 = scmp.lt.s32.totalorder %s1679_s24, 3 }
   0xf   : > { %p365_p9 = pnand %p1359_p7, %p364_p8 }
  0x10   : > { %p405_p10 = scmp.lt.s32.totalorder (!%p365_p9), %s1784_s25, 1  ;;  %vm413_vm0 = vcmask (!%p365_p9), 261120   ;;  %s2050_s0 = sld [smem:[#allocation6_spill]] (!%p365_p9)  ;;  %v1681_v8 = vmov (!%p365_p9), 0.0   ;;  %vm1682_vm1 = vmmov (!%p365_p9), 0   ;;  %vm506_vm2 = vcmask (!%p365_p9), 64512  }
  0x11   : > { %368 = sbr.rel (%p365_p9) target bundleno = 2644 (0xa54), region = 68  ;;  %s2051_s1 = sld [smem:[#allocation7_spill]] (!%p365_p9)  ;;  %1432 = vmatprep.subr.bf16.mxu0 (!%p365_p9), %v1681_v8  ;;  %1436 = vmatprep.mubr.msk.bf16.mxu0 (!%p365_p9), %vm1682_vm1, %v1681_v8  ;;  %v1362_v14 = vld [vmem:[%s2037_s4] ss:$0 sm:$0xff] (!%p365_p9)  ;;  %vm573_vm3 = vcmask (!%p365_p9), 1043456   ;;  %vm735_vm4 = vcmask (!%p365_p9), 130112  }
  0x12   : > { %1452 = vmatprep.subr.bf16.mxu1 (!%p365_p9), %v1681_v8  ;;  %1454 = vmatprep.mubr.msk.bf16.mxu1 (!%p365_p9), %vm1682_vm1, %v1681_v8  ;;  %v1363_v16 = vld [vmem:[%s2038_s5] ss:$0 sm:$0xff] (!%p365_p9)  ;;  %s1684_s20 = smov (!%p365_p9), 96   ;;  %s1685_s26 = smov (!%p365_p9), 88   ;;  %vm854_vm5 = vcmask (!%p365_p9), 195712   ;;  %vm973_vm6 = vcmask (!%p365_p9), 261312  }
  0x13   : > { %s1686_s28 = smov (!%p365_p9), 80   ;;  %s1687_s29 = smov (!%p365_p9), 112  }
  0x14   : > { %s1690_s17 = smov (!%p365_p9), 64   ;;  %s1691_s18 = smov (!%p365_p9), 56  }
  0x17   : > { %v1579_v7 = vld [vmem:[%s2051_s1] sm:$0xff] (!%p365_p9)   ;;  %v1580_v9 = vld [vmem:[%s2051_s1 + $0x8] sm:$0xff] (!%p365_p9)  }
  0x18   : > { %s406_s15 = scalar_select %p405_p10, %s1784_s25, 1  ;;  %1433 = vmatpush3.bf16.msra.mxu0 %v1579_v7 }
  0x19   : > { %1434 = vmatprep.subr.bf16.mxu0 %v1681_v8 }
  0x1a   : > { %s1361_s16 = sshll.u32 %s406_s15, 3  ;;  %s1688_s15 = smov 72  }
  0x1b   : > { %s408_s19 = scalar_lea.vmem %s2050_s0, %s1361_s16  ;;  %s1689_s16 = smov 104  }
  0x1c   : > { %v1816_v0 = vld [vmem:[%s408_s19] sm:$0xff]  ;;  %1435 = vmatpush3.bf16.msra.mxu0 %v1580_v9  ;;  %s1683_s19 = smov 120  }
  0x1d   : > { %v414_v1 = vsel %vm413_vm0, %v1816_v0, 0.0  ;;  %1440 = vmatprep.subr.bf16.mxu0 %v1681_v8 }
  0x1e   : > { %415 = vadd.xlane.f32.xlu0 %v414_v1 }
  0xab   : > { %v416_v2 = vpop.xlane.xlu0 %415 }
  0xac   : > { %v418_v3 = vmul.f32 0.03125, %v416_v2 }
  0xae   : > { %v419_v4 = vsub.f32 %v1816_v0, %v418_v3 }
  0xb0   : > { %v420_v5 = vmul.f32 %v419_v4, %v419_v4 }
  0xb2   : > { %v421_v6 = vsel %vm413_vm0, %v420_v5, 0.0 }
  0xb3   : > { %422 = vadd.xlane.f32.xlu0 %v421_v6 }
 0x140   : > { %v423_v10 = vpop.xlane.xlu0 %422 }
 0x141   : > { %v424_v11 = vmul.f32 0.03125, %v423_v10 }
 0x143   : > { %v425_v12 = vadd.f32 1e-05, %v424_v11 }
 0x145   : > { %1593 = vrsqrt.f32 %v425_v12 }
 0x14f   : > { %v1594_v13 = vpop.eup %1593 }
 0x150   : > { %v427_v15 = vmul.f32 %v1594_v13, %v419_v4 }
 0x152   : > { %v434_v17 = vmul.f32 %v1362_v14, %v427_v15 }
 0x154   : > { %v441_v18 = vadd.f32 %v1363_v16, %v434_v17 }
 0x156   : > { %v442_v19 = vpack.c.bf16 %v441_v18, %v441_v18 }
 0x158   : > { %1437 = vmatmul.mubr.msk.bf16.vlgmr.msra.gmra.mrb[0].mxu0 %vm413_vm0, %v442_v19 }
 0x159   : > { %1442 = vmatprep.mubr.msk.bf16.mxu0 %vm1682_vm1, %v1681_v8 }
 0x22b   : > { %v496_v20 = vpop.f32.mrb[0].mxu0 }
 0x22c   : > { %v1845_v21 = vpack.c.bf16 %v496_v20, %v496_v20  ;;  %v1438_v22 = vpop.f32.mrb[1].mxu0 }
 0x22d   : > { %v499_v23 = vpop.f32.mrb[2].mxu0 }
 0x22e   : > { %618 = vrot.lane.b32.xlu0 %v1845_v21, %s1683_s19  ;;  %504 = vrot.lane.b32.xlu1 %v1845_v21, %s1684_s20  ;;  %v1439_v24 = vpop.f32.mrb[3].mxu0  ;;  %s1692_s19 = smov 48   ;;  %s1693_s20 = smov 40  }
 0x232   : > { %620 = vrot.lane.b32.xlu1 %v1845_v21, %s1685_s26  ;;  %s1694_s26 = smov 8  }
 0x236   : > { %739 = vrot.lane.b32.xlu1 %v1845_v21, %s1686_s28  ;;  %s1697_s28 = smov [#allocation3]  }
 0x23a   : > { %737 = vrot.lane.b32.xlu1 %v1845_v21, %s1687_s29  ;;  %s1621_s29 = sshll.u32 %s1697_s28, 4  ;;  %s1622_s29 = int_to_ptr.vmem [resolvable:$false] %s1621_s29 }
 0x23b   : > { %s1623_s1 = scalar_lea.vmem %s1622_s29, 256 }
 0x23e   : > { %858 = vrot.lane.b32.xlu1 %v1845_v21, %s1688_s15  ;;  %s1395_s15 = sshll.u32 %s1784_s25, 7 }
 0x23f   : > { %s1990_s0 = scalar_lea.hbm %s2045_s12, %s1395_s15 }
 0x242   : > { %856 = vrot.lane.b32.xlu1 %v1845_v21, %s1689_s16 }
 0x2a0   : > { %v505_v25 = vpop.permute.xlu1 %504  ;;  %v619_v30 = vpop.permute.xlu0 %618 }
 0x2a1   : > { %v511_v26 = vsel %vm506_vm2, %v505_v25, 0 }
 0x2a2   : > { %1441 = vmatpush3.bf16.xpose.msra.mxu0 %v511_v26 }
 0x2a3   : > { %1446 = vmatprep.subr.bf16.mxu0 %v1681_v8 }
 0x2a4   : > { %v621_v27 = vpop.permute.xlu1 %620 }
 0x2a5   : > { %v626_v28 = vsel %vm506_vm2, %v621_v27, 0 }
 0x2a6   : > { %1453 = vmatpush3.bf16.xpose.msra.mxu1 %v626_v28 }
 0x2a7   : > { %1464 = vmatprep.subr.bf16.mxu1 %v1681_v8 }
 0x2a8   : > { %v740_v29 = vpop.permute.xlu1 %739 }
 0x2a9   : > { %1443 = vmatmul.mubr.msk.bf16.vlgmr.msra.gmra.mrb[4].mxu0 %vm506_vm2, %v1845_v21  ;;  %v745_v32 = vsel %vm506_vm2, %v740_v29, 0 }
 0x2aa   : > { %1448 = vmatprep.mubr.msk.bf16.mxu0 %vm1682_vm1, %v1681_v8 }
 0x2ac   : > { %v738_v31 = vpop.permute.xlu1 %737 }
 0x2ad   : > { %1455 = vmatmul.mubr.msk.bf16.vlgmr.msra.gmra.mrb[0].mxu1 %vm506_vm2, %v619_v30 }
 0x2ae   : > { %1465 = vmatpush3.bf16.xpose.msra.mxu1 %v745_v32  ;;  %1466 = vmatprep.mubr.msk.bf16.mxu1 %vm1682_vm1, %v1681_v8 }
 0x2af   : > { %1476 = vmatprep.subr.bf16.mxu1 %v1681_v8 }
 0x2b0   : > { %v859_v33 = vpop.permute.xlu1 %858 }
 0x2b1   : > { %v864_v34 = vsel %vm506_vm2, %v859_v33, 0 }
 0x2b4   : > { %v857_v35 = vpop.permute.xlu1 %856 }
 0x2b5   : > { %1467 = vmatmul.mubr.msk.bf16.vlgmr.msra.gmra.mrb[4].mxu1 %vm506_vm2, %v738_v31 }
 0x2b6   : > { %1477 = vmatpush3.bf16.xpose.msra.mxu1 %v864_v34  ;;  %1478 = vmatprep.mubr.msk.bf16.mxu1 %vm1682_vm1, %v1681_v8 }
 0x2b7   : > { %1488 = vmatprep.subr.bf16.mxu1 %v1681_v8 }
 0x2bd   : > { %1479 = vmatmul.mubr.msk.bf16.vlgmr.msra.gmra.mrb[8].mxu1 %vm506_vm2, %v857_v35 }
 0x2be   : > { %1492 = vmatprep.mubr.msk.bf16.mxu1 %vm1682_vm1, %v1681_v8 }
 0x37c   : > { %v547_v36 = vpop.f32.mrb[4].mxu0 }
 0x37d   : > { %v1444_v37 = vpop.f32.mrb[5].mxu0  ;;  %v553_v38 = vsel %vm506_vm2, %v547_v36, -inf }
 0x37e   : > { %554 = vmax.xlane.f32.xlu1 %v553_v38  ;;  %v550_v39 = vpop.f32.mrb[6].mxu0 }
 0x37f   : > { %v1445_v40 = vpop.f32.mrb[7].mxu0 }
 0x380   : > { %v662_v41 = vpop.f32.mrb[0].mxu1 }
 0x381   : > { %v1456_v42 = vpop.f32.mrb[1].mxu1  ;;  %v668_v43 = vsel %vm506_vm2, %v662_v41, -inf }
 0x382   : > { %669 = vmax.xlane.f32.xlu0 %v668_v43  ;;  %v665_v44 = vpop.f32.mrb[2].mxu1 }
 0x383   : > { %v1457_v45 = vpop.f32.mrb[3].mxu1 }
 0x388   : > { %v781_v46 = vpop.f32.mrb[4].mxu1 }
 0x389   : > { %v1468_v47 = vpop.f32.mrb[5].mxu1  ;;  %v787_v48 = vsel %vm506_vm2, %v781_v46, -inf }
 0x38a   : > { %v784_v49 = vpop.f32.mrb[6].mxu1  ;;  %788 = vmax.xlane.f32.xlu1 %v787_v48 }
 0x38b   : > { %v1469_v50 = vpop.f32.mrb[7].mxu1 }
 0x390   : > { %v900_v51 = vpop.f32.mrb[8].mxu1 }
 0x391   : > { %v1480_v52 = vpop.f32.mrb[9].mxu1  ;;  %v906_v53 = vsel %vm506_vm2, %v900_v51, -inf }
 0x392   : > { %907 = vmax.xlane.f32.xlu0 %v906_v53  ;;  %v903_v54 = vpop.f32.mrb[10].mxu1 }
 0x393   : > { %v1481_v55 = vpop.f32.mrb[11].mxu1 }
 0x40b   : > { %v555_v56 = vpop.xlane.xlu1 %554 }
 0x40c   : > { %v556_v57 = vsub.f32 %v547_v36, %v555_v56 }
 0x40e   : > { %v557_v58 = vmul.f32 1.442695, %v556_v57 }
 0x40f   : > { %v670_v59 = vpop.xlane.xlu0 %669 }
 0x410   : > { %1595 = vpow2.f32 %v557_v58  ;;  %v671_v60 = vsub.f32 %v662_v41, %v670_v59  ;;  %v1581_v58 = vld [vmem:[%s2035_s2] sm:$0xff]   ;;  %v1582_v59 = vld [vmem:[%s2035_s2 + $0x8] sm:$0xff]  }
 0x411   : > { %1489 = vmatpush3.bf16.msra.mxu1 %v1581_v58 }
 0x412   : > { %v672_v61 = vmul.f32 1.442695, %v671_v60  ;;  %1490 = vmatprep.subr.bf16.mxu1 %v1681_v8 }
 0x414   : > { %1597 = vpow2.f32 %v672_v61 }
 0x415   : > { %1491 = vmatpush3.bf16.msra.mxu1 %v1582_v59 }
 0x416   : > { %1504 = vmatprep.subr.bf16.mxu1 %v1681_v8 }
 0x417   : > { %v789_v9 = vpop.xlane.xlu1 %788 }
 0x418   : > { %v790_v10 = vsub.f32 %v781_v46, %v789_v9 }
 0x41a   : > { %v1596_v62 = vpop.eup %1595  ;;  %v791_v11 = vmul.f32 1.442695, %v790_v10 }
 0x41b   : > { %v559_v63 = vsel %vm506_vm2, %v1596_v62, 0.0 }
 0x41c   : > { %560 = vadd.xlane.f32.xlu1 %v559_v63 }
 0x41e   : > { %v1598_v1 = vpop.eup %1597 }
 0x41f   : > { %v908_v2 = vpop.xlane.xlu0 %907  ;;  %v674_v3 = vsel %vm506_vm2, %v1598_v1, 0.0 }
 0x420   : > { %v909_v4 = vsub.f32 %v900_v51, %v908_v2  ;;  %675 = vadd.xlane.f32.xlu0 %v674_v3 }
 0x422   : > { %v910_v5 = vmul.f32 1.442695, %v909_v4 }
 0x424   : > { %1599 = vpow2.f32 %v910_v5 }
 0x425   : > { %1601 = vpow2.f32 %v791_v11  ;;  %v1375_v11 = vld [vmem:[%s2036_s3] ss:$0 sm:$0xff] }
 0x42d   : > { %568 = vrot.lane.b32.xlu1 %v1845_v21, %s1690_s17  ;;  %s1695_s17 = smov 16  }
 0x42e   : > { %v1882_v6 = vpop.eup %1599 }
 0x42f   : > { %v912_v7 = vsel %vm506_vm2, %v1882_v6, 0.0  ;;  %v1602_v12 = vpop.eup %1601 }
 0x430   : > { %913 = vadd.xlane.f32.xlu0 %v912_v7  ;;  %v793_v13 = vsel %vm506_vm2, %v1602_v12, 0.0 }
 0x446   : > { %683 = vrot.lane.b32.xlu0 %v1845_v21, %s1691_s18  ;;  %s1696_s18 = smov 24  }
 0x451   : > { %794 = vadd.xlane.f32.xlu1 %v793_v13 }
 0x462   : > { %802 = vrot.lane.b32.xlu1 %v1845_v21, %s1692_s19 }
 0x466   : > { %921 = vrot.lane.b32.xlu1 %v1845_v21, %s1693_s20  ;;  %s402_s20 = sand.u32 1, %s1671_s22  }
 0x467   : > { %s1284_s25 = scalar_lea.sflag [#allocation4], %s402_s20 }
 0x4a9   : > { %v561_v14 = vpop.xlane.xlu1 %560 }
 0x4aa   : > { %1603 = vrcp.f32 %v561_v14 }
 0x4ad   : > { %v676_v15 = vpop.xlane.xlu0 %675  ;;  %v569_v16 = vpop.permute.xlu1 %568 }
 0x4ae   : > { %1605 = vrcp.f32 %v676_v15  ;;  %v575_v17 = vsel %vm573_vm3, %v569_v16, 0 }
 0x4af   : > { %1447 = vmatpush3.bf16.msra.mxu0 %v575_v17 }
 0x4b0   : > { %1458 = vmatprep.subr.bf16.mxu0 %v1681_v8 }
 0x4b4   : > { %v1604_v18 = vpop.eup %1603 }
 0x4b5   : > { %v563_v19 = vmul.f32 %v1604_v18, %v561_v14 }
 0x4b7   : > { %v564_v20 = vsub.f32 2.0, %v563_v19 }
 0x4b8   : > { %v1606_v22 = vpop.eup %1605 }
 0x4b9   : > { %v565_v23 = vmul.f32 %v1604_v18, %v564_v20  ;;  %v678_v24 = vmul.f32 %v1606_v22, %v676_v15 }
 0x4bb   : > { %v566_v25 = vmul.f32 %v1596_v62, %v565_v23  ;;  %v679_v26 = vsub.f32 2.0, %v678_v24 }
 0x4bd   : > { %v567_v21 = vpack.c.bf16 %v566_v25, %v566_v25  ;;  %v680_v27 = vmul.f32 %v1606_v22, %v679_v26  ;;  %v914_v28 = vpop.xlane.xlu0 %913  ;;  %v1583_v25 = vld [vmem:[%s2041_s8] sm:$0xff]  }
 0x4be   : > { %1607 = vrcp.f32 %v914_v28 }
 0x4bf   : > { %1449 = vmatmul.mubr.msk.bf16.vlgmr.msra.gmra.mrb[8].mxu0 %vm506_vm2, %v567_v21  ;;  %v681_v29 = vmul.f32 %v1598_v1, %v680_v27 }
 0x4c0   : > { %1460 = vmatprep.mubr.msk.bf16.mxu0 %vm1682_vm1, %v1681_v8 }
 0x4c1   : > { %v684_v30 = vpop.permute.xlu0 %683  ;;  %v682_v32 = vpack.c.bf16 %v681_v29, %v681_v29  ;;  %v1379_v29 = vld [vmem:[%s2039_s6] ss:$0 sm:$0xff] }
 0x4c2   : > { %v689_v31 = vsel %vm573_vm3, %v684_v30, 0 }
 0x4c3   : > { %1459 = vmatpush3.bf16.msra.mxu0 %v689_v31  ;;  %v1380_v31 = vld [vmem:[%s2040_s7] ss:$0 sm:$0xff] }
 0x4c4   : > { %1470 = vmatprep.subr.bf16.mxu0 %v1681_v8 }
 0x4c7   : > { %1461 = vmatmul.mubr.msk.bf16.vlgmr.msra.gmra.mrb[12].mxu0 %vm506_vm2, %v682_v32 }
 0x4c8   : > { %1472 = vmatprep.mubr.msk.bf16.mxu0 %vm1682_vm1, %v1681_v8  ;;  %v1608_v36 = vpop.eup %1607 }
 0x4c9   : > { %v916_v38 = vmul.f32 %v1608_v36, %v914_v28 }
 0x4cb   : > { %v917_v41 = vsub.f32 2.0, %v916_v38  ;;  %v1588_v38 = vld [vmem:[%s2043_s10 + $0x18] sm:$0xff]  }
 0x4cd   : > { %v918_v45 = vmul.f32 %v1608_v36, %v917_v41  ;;  %v1586_v36 = vld [vmem:[%s2043_s10 + $0x8] sm:$0xff]   ;;  %v1591_v41 = vld [vmem:[%s2043_s10 + $0x30] sm:$0xff]  }
 0x4cf   : > { %v919_v48 = vmul.f32 %v1882_v6, %v918_v45 }
 0x4d1   : > { %v920_v49 = vpack.c.bf16 %v919_v48, %v919_v48 }
 0x4de   : > { %v795_v33 = vpop.xlane.xlu1 %794 }
 0x4df   : > { %1609 = vrcp.f32 %v795_v33 }
 0x4e2   : > { %v803_v34 = vpop.permute.xlu1 %802 }
 0x4e3   : > { %v808_v35 = vsel %vm573_vm3, %v803_v34, 0 }
 0x4e4   : > { %1471 = vmatpush3.bf16.msra.mxu0 %v808_v35  ;;  %v1585_v35 = vld [vmem:[%s2043_s10] sm:$0xff]  }
 0x4e5   : > { %1482 = vmatprep.subr.bf16.mxu0 %v1681_v8 }
 0x4e6   : > { %v922_v44 = vpop.permute.xlu1 %921 }
 0x4e7   : > { %v927_v47 = vsel %vm573_vm3, %v922_v44, 0 }
 0x4e9   : > { %v1610_v37 = vpop.eup %1609 }
 0x4ea   : > { %v797_v39 = vmul.f32 %v1610_v37, %v795_v33 }
 0x4ec   : > { %v798_v40 = vsub.f32 2.0, %v797_v39  ;;  %v1589_v39 = vld [vmem:[%s2043_s10 + $0x20] sm:$0xff]  }
 0x4ee   : > { %v799_v42 = vmul.f32 %v1610_v37, %v798_v40  ;;  %v1587_v37 = vld [vmem:[%s2043_s10 + $0x10] sm:$0xff]   ;;  %v1590_v40 = vld [vmem:[%s2043_s10 + $0x28] sm:$0xff]  }
 0x4f0   : > { %v800_v43 = vmul.f32 %v1602_v12, %v799_v42  ;;  %v1592_v42 = vld [vmem:[%s2043_s10 + $0x38] sm:$0xff]  }
 0x4f2   : > { %v801_v46 = vpack.c.bf16 %v800_v43, %v800_v43  ;;  %v1381_v43 = vld [vmem:[%s2042_s9] ss:$0 sm:$0xff] }
 0x4f4   : > { %1473 = vmatmul.mubr.msk.bf16.vlgmr.msra.gmra.mrb[16].mxu0 %vm506_vm2, %v801_v46 }
 0x4f5   : > { %1483 = vmatpush3.bf16.msra.mxu0 %v927_v47  ;;  %1484 = vmatprep.mubr.msk.bf16.mxu0 %vm1682_vm1, %v1681_v8 }
 0x4f6   : > { %1496 = vmatprep.subr.bf16.mxu0 %v1681_v8 }
 0x4fc   : > { %1485 = vmatmul.mubr.msk.bf16.vlgmr.msra.gmra.mrb[20].mxu0 %vm506_vm2, %v920_v49 }
 0x4fd   : > { %1500 = vmatprep.mubr.msk.bf16.mxu0 %vm1682_vm1, %v1681_v8  ;;  %1497 = vmatpush3.bf16.msra.mxu0 %v1583_v25 }
 0x4fe   : > { %1498 = vmatprep.subr.bf16.mxu0 %v1681_v8 }
 0x592   : > { %v611_v50 = vpop.f32.mrb[8].mxu0 }
 0x593   : > { %617 = vst.msk [vmem:[#allocation2] sm:$0xff] %vm506_vm2, %v611_v50  ;;  %v1450_v51 = vpop.f32.mrb[9].mxu0 }
 0x594   : > { %v614_v52 = vpop.f32.mrb[10].mxu0 }
 0x595   : > { %v1451_v53 = vpop.f32.mrb[11].mxu0 }
 0x59a   : > { %v725_v54 = vpop.f32.mrb[12].mxu0 }
 0x59b   : > { %732 = vrot.lane.b32.xlu0 %v725_v54, %s1694_s26  ;;  %v1462_v55 = vpop.f32.mrb[13].mxu0  ;;  %s1360_s26 = sshll.u32 %s402_s20, 3 }
 0x59c   : > { %v728_v56 = vpop.f32.mrb[14].mxu0  ;;  %s404_s16 = scalar_lea.vmem [#allocation3], %s1360_s26 }
 0x59d   : > { %v1463_v57 = vpop.f32.mrb[15].mxu0 }
 0x5c7   : > { %v844_v60 = vpop.f32.mrb[16].mxu0 }
 0x5c8   : > { %851 = vrot.lane.b32.xlu1 %v844_v60, %s1695_s17  ;;  %v1474_v61 = vpop.f32.mrb[17].mxu0  ;;  %s1297_s17 = sshll.u32 %s404_s16, 4  ;;  %s1992_s17 = int_to_ptr.vmem [resolvable:$true] %s1297_s17 }
 0x5c9   : > { %v847_v62 = vpop.f32.mrb[18].mxu0  ;;  %s1617_s26 = scalar_lea.vmem %s1992_s17, 128  ;;  %p1624_p0 = scmp.lt.s32.totalorder %s1992_s17, %s1622_s29 }
 0x5ca   : > { %v1475_v63 = vpop.f32.mrb[19].mxu0  ;;  %p1618_p11 = scmp.ne.s32.totalorder %s1992_s17, %s1617_s26  ;;  %p1625_p1 = scmp.lt.s32.totalorder %s1623_s1, %s1617_s26 }
 0x5cc   : > { %p1619_p12 = pnand %p1618_p11, %p1801_p5  ;;  %p1626_p2 = por %p1625_p1, %p1624_p0 }
 0x5ce   : > { %p1620_p13 = pneg %p1619_p12 }
 0x5cf   : > { %v963_v1 = vpop.f32.mrb[20].mxu0 }
 0x5d0   : > { %970 = vrot.lane.b32.xlu0 %v963_v1, %s1696_s18  ;;  %v1486_v2 = vpop.f32.mrb[21].mxu0  ;;  %p1627_p3 = pnand %p1626_p2, %p1620_p13 }
 0x5d1   : > { %v966_v3 = vpop.f32.mrb[22].mxu0 }
 0x5d2   : > { %v1487_v4 = vpop.f32.mrb[23].mxu0 }
 0x60d   : > { %v733_v5 = vpop.permute.xlu0 %732 }
 0x60e   : > { %736 = vst.msk [vmem:[#allocation2] sm:$0xff] %vm735_vm4, %v733_v5 }
 0x63a   : > { %v852_v6 = vpop.permute.xlu1 %851 }
 0x63b   : > { %855 = vst.msk [vmem:[#allocation2] sm:$0xff] %vm854_vm5, %v852_v6 }
 0x642   : > { %v971_v7 = vpop.permute.xlu0 %970 }
 0x643   : > { %974 = vst.msk [vmem:[#allocation2] sm:$0xff] %vm973_vm6, %v971_v7 }
 0x64a   : > { %v975_v9 = vld [vmem:[#allocation2] sm:$0xff] }
 0x64b   : > { %v976_v10 = vpack.c.bf16 %v975_v9, %v975_v9 }
 0x64d   : > { %1493 = vmatmul.mubr.msk.bf16.vlgmr.msra.gmra.mrb[12].mxu1 %vm413_vm0, %v976_v10 }
 0x64e   : > { %1520 = vmatprep.mubr.msk.bf16.mxu1 %vm1682_vm1, %v1681_v8  ;;  %1505 = vmatpush3.bf16.msra.mxu1 %v1585_v35 }
 0x64f   : > { %1506 = vmatprep.subr.bf16.mxu1 %v1681_v8 }
 0x652   : > { %1507 = vmatpush3.bf16.msra.mxu1 %v1586_v36 }
 0x653   : > { %1508 = vmatprep.subr.bf16.mxu1 %v1681_v8 }
 0x656   : > { %1509 = vmatpush3.bf16.msra.mxu1 %v1587_v37 }
 0x657   : > { %1510 = vmatprep.subr.bf16.mxu1 %v1681_v8 }
 0x65a   : > { %1511 = vmatpush3.bf16.msra.mxu1 %v1588_v38 }
 0x65b   : > { %1512 = vmatprep.subr.bf16.mxu1 %v1681_v8 }
 0x65e   : > { %1513 = vmatpush3.bf16.msra.mxu1 %v1589_v39 }
 0x65f   : > { %1514 = vmatprep.subr.bf16.mxu1 %v1681_v8 }
 0x662   : > { %1515 = vmatpush3.bf16.msra.mxu1 %v1590_v40 }
 0x663   : > { %1516 = vmatprep.subr.bf16.mxu1 %v1681_v8 }
 0x666   : > { %1517 = vmatpush3.bf16.msra.mxu1 %v1591_v41 }
 0x667   : > { %1518 = vmatprep.subr.bf16.mxu1 %v1681_v8 }
 0x66a   : > { %1519 = vmatpush3.bf16.msra.mxu1 %v1592_v42 }
 0x720   : > { %v1037_v12 = vpop.f32.mrb[12].mxu1 }
 0x721   : > { %v1038_v13 = vadd.f32 %v1375_v11, %v1037_v12  ;;  %v1494_v14 = vpop.f32.mrb[13].mxu1 }
 0x722   : > { %v1040_v15 = vpop.f32.mrb[14].mxu1 }
 0x723   : > { %v1927_v16 = vadd.f32 %v1038_v13, %v1816_v0  ;;  %v1495_v17 = vpop.f32.mrb[15].mxu1  ;;  %v1584_v0 = vld [vmem:[%s2041_s8 + $0x8] sm:$0xff]   ;;  %v1385_v15 = vld [vmem:[%s2044_s11] ss:$0 sm:$0xff] }
 0x724   : > { %1499 = vmatpush3.bf16.msra.mxu0 %v1584_v0 }
 0x725   : > { %v1046_v18 = vsel %vm413_vm0, %v1927_v16, 0.0 }
 0x726   : > { %1047 = vadd.xlane.f32.xlu1 %v1046_v18 }
 0x7b3   : > { %v1048_v19 = vpop.xlane.xlu1 %1047 }
 0x7b4   : > { %v1049_v20 = vmul.f32 0.03125, %v1048_v19 }
 0x7b6   : > { %v1050_v22 = vsub.f32 %v1927_v16, %v1049_v20 }
 0x7b8   : > { %v1051_v23 = vmul.f32 %v1050_v22, %v1050_v22 }
 0x7ba   : > { %v1052_v24 = vsel %vm413_vm0, %v1051_v23, 0.0 }
 0x7bb   : > { %1053 = vadd.xlane.f32.xlu0 %v1052_v24 }
 0x848   : > { %v1054_v26 = vpop.xlane.xlu0 %1053 }
 0x849   : > { %v1055_v21 = vmul.f32 0.03125, %v1054_v26 }
 0x84b   : > { %v1056_v27 = vadd.f32 1e-05, %v1055_v21 }
 0x84d   : > { %1611 = vrsqrt.f32 %v1056_v27 }
 0x857   : > { %v1612_v28 = vpop.eup %1611 }
 0x858   : > { %v1058_v30 = vmul.f32 %v1612_v28, %v1050_v22 }
 0x85a   : > { %v1065_v32 = vmul.f32 %v1379_v29, %v1058_v30 }
 0x85c   : > { %v1072_v33 = vadd.f32 %v1380_v31, %v1065_v32 }
 0x85e   : > { %v1073_v34 = vpack.c.bf16 %v1072_v33, %v1072_v33 }
 0x860   : > { %1501 = vmatmul.mubr.msk.bf16.vlgmr.msra.gmra.mrb[24].mxu0 %vm413_vm0, %v1073_v34 }
 0x933   : > { %v1134_v44 = vpop.f32.mrb[24].mxu0 }
 0x934   : > { %v1135_v45 = vadd.f32 %v1381_v43, %v1134_v44  ;;  %v1502_v46 = vpop.f32.mrb[25].mxu0 }
 0x935   : > { %v1137_v47 = vpop.f32.mrb[26].mxu0 }
 0x936   : > { %v1141_v48 = vmul.f32 0.70710677, %v1135_v45  ;;  %v1503_v49 = vpop.f32.mrb[27].mxu0  ;;  %v1140_v11 = vmul.f32 0.5, %v1135_v45 }
 0x938   : > { %v1142_v50 = vand.u32 2147483647, %v1141_v48  ;;  %vm1164_vm7 = vcmp.lt.f32.partialorder %v1141_v48, 0.0 }
 0x93a   : > { %v1143_v51 = vmul.f32 0.3275911, %v1142_v50  ;;  %v1158_v54 = vsub.f32 0.0, %v1142_v50 }
 0x93c   : > { %v1144_v52 = vadd.f32 1.0, %v1143_v51  ;;  %v1159_v57 = vmul.f32 %v1158_v54, %v1142_v50 }
 0x93e   : > { %1613 = vrcp.f32 %v1144_v52  ;;  %v1160_v60 = vmul.f32 1.442695, %v1159_v57 }
 0x940   : > { %1615 = vpow2.f32 %v1160_v60 }
 0x948   : > { %v1614_v8 = vpop.eup %1613 }
 0x949   : > { %v1146_v53 = vmul.f32 %v1614_v8, %v1144_v52 }
 0x94a   : > { %v1616_v5 = vpop.eup %1615 }
 0x94b   : > { %v1147_v55 = vsub.f32 2.0, %v1146_v53 }
 0x94d   : > { %v1148_v56 = vmul.f32 %v1614_v8, %v1147_v55 }
 0x94f   : > { %v1149_v58 = vmul.f32 1.0614054, %v1148_v56 }
 0x951   : > { %v1150_v59 = vadd.f32 -1.4531521, %v1149_v58 }
 0x953   : > { %v1151_v61 = vmul.f32 %v1150_v59, %v1148_v56 }
 0x955   : > { %v1152_v62 = vadd.f32 1.4214138, %v1151_v61 }
 0x957   : > { %v1153_v63 = vmul.f32 %v1152_v62, %v1148_v56 }
 0x959   : > { %v1154_v1 = vadd.f32 -0.28449672, %v1153_v63 }
 0x95b   : > { %v1155_v2 = vmul.f32 %v1154_v1, %v1148_v56 }
 0x95d   : > { %v1156_v3 = vadd.f32 0.2548296, %v1155_v2 }
 0x95f   : > { %v1157_v4 = vmul.f32 %v1156_v3, %v1148_v56 }
 0x961   : > { %v1162_v6 = vmul.f32 %v1616_v5, %v1157_v4 }
 0x963   : > { %v1163_v7 = vsub.f32 1.0, %v1162_v6 }
 0x965   : > { %v1165_v9 = vsub.f32 0.0, %v1163_v7 }
 0x967   : > { %v1166_v10 = vsel %vm1164_vm7, %v1165_v9, %v1163_v7 }
 0x968   : > { %v1167_v12 = vadd.f32 1.0, %v1166_v10 }
 0x96a   : > { %v1168_v13 = vmul.f32 %v1167_v12, %v1140_v11 }
 0x96c   : > { %v1169_v14 = vpack.c.bf16 %v1168_v13, %v1168_v13 }
 0x96e   : > { %1521 = vmatmul.mubr.bf16.vlgmr.msra.gmra.mrb[16].mxu1 %v1169_v14 }
 0xa41   : > { %v1275_v17 = vpop.f32.mrb[16].mxu1 }
 0xa42   : > { %v1276_v18 = vadd.f32 %v1385_v15, %v1275_v17  ;;  %v1522_v19 = vpop.f32.mrb[17].mxu1 }
 0xa43   : > { %v1278_v20 = vpop.f32.mrb[18].mxu1 }
 0xa44   : > { %v1281_v22 = vadd.f32 %v1276_v18, %v1927_v16  ;;  %v1523_v23 = vpop.f32.mrb[19].mxu1 }
 0xa46   : > { %1282 = vst.msk [vmem:[%s404_s16] sm:$0xff] %vm413_vm0, %v1281_v22 }
 0xa47   : > { %1630 = shalt.err (!%p1627_p3)
}
 0xa48   : > { %s1631_s20 = scalar_lea.hbm %s1990_s0, 128  ;;  %s1635_s18 = scalar_lea.hbm %s2045_s12, 256 }
 0xa49   : > { %p1632_p4 = scmp.ne.s32.totalorder %s1990_s0, %s1631_s20  ;;  %p1636_p9 = scmp.lt.u32.totalorder %s1990_s0, %s2045_s12 }
 0xa4a   : > { %p1637_p10 = scmp.lt.u32.totalorder %s1635_s18, %s1631_s20  ;;  %p1639_p12 = scmp.lt.u32.totalorder %s1631_s20, %s1990_s0 }
 0xa4b   : > { %p1633_p7 = pnand %p1632_p4, %p1801_p5 }
 0xa4c   : > { %p1638_p11 = por %p1637_p10, %p1636_p9 }
 0xa4d   : > { %p1634_p8 = pneg %p1633_p7 }
 0xa4e   : > { %p1640_p13 = por %p1639_p12, %p1638_p11 }
 0xa50   : > { %p1641_p0 = pnand %p1640_p13, %p1634_p8 }
 0xa52   : > { %1644 = shalt.err (!%p1641_p0)
}
 0xa53   : > { %1524 = dma.vmem_to_hbm [thread:$0]  (%p1801_p5), %s1992_s17, 128, %s1990_s0, %s1284_s25  }
 0xa54 PF: > { %p1530_p1 = scmp.ge.s32.totalorder %s1679_s24, 2  ;;  %s1309_s1 = sand.u32 1, %s1667_s21  }
 0xa55   : > { %s1310_s26 = scalar_lea.sflag [#allocation4], %s1309_s1 }
 0xa56   : > { %p1527_p2 = pnand %p1530_p1, %p1805_p6 }
 0xa58   : > { %1662 = dma.done.wait (!%p1527_p2), %s1310_s26, 128  }
 0xa59   : > { %1664 = vsyncadd (!%p1527_p2), %s1310_s26, 4294967168  ;;  %p22_p3 = scmp.ge.s32.totalorder %s1788_s27, 4   ;;  %s2052_s21 = smov %s1671_s22 }
 0xa5a   : > { %s2053_s22 = smov %s1675_s23  ;;  %s2054_s23 = smov %s1799_s30 }
 0xa5b   : > { %s2055_s24 = smov %s1788_s27  ;;  %24 = sbr.rel (!%p22_p3) target bundleno = 6 (0x6), region = 103 }
 0xa62   :  { %1315 = vsyncpa [#allocation4], 1 }
 0xa63   :  { %1317 = vsyncpa [#allocation4 + $0x1], 1 }

</bundles_post_ra>
